<compile_context>
chip_gen: v7x
topology: tpu7x:2x2x1
jax: 0.10.0
libtpu: 0.0.40
codegen_flags: <defaults>
</compile_context>

<pallas_src>
import jax
import jax.numpy as jnp
from jax.experimental import pallas as pl
from jax.experimental.pallas import tpu as pltpu
from jax.scipy.linalg import block_diag

# ----- static configuration (mirrors PureCNN(size=4, output_size=10)) -----
SIZE = 4                       # "size" argument of PureCNN
OUT_SIZE = 10                  # output_size
B = 2                          # real batch
BP = 8                         # batch padded to a full sublane group
H = W = 16                     # small image consistent with conv k=5, stride=2
CIN, COUT, K, STRIDE = 3, 6, 5, 2
OH = (H - K) // STRIDE + 1     # 6   conv output spatial
PH = OH // 2                   # 3   after MaxPool2d(2)
S = PH * PH                    # 9   pooled spatial positions
CKK = CIN * K * K              # 75  conv patch size
FLAT = S * COUT                # 54  LazyLinear in_features
CNN_OUT = SIZE * SIZE * 2      # 32
Q_IN = SIZE + 2 + 3            # 9
MLP_OUT = 16
P = 128                        # padded lane width for every feature axis
KP = 768                       # S*CKK = 675 padded to a multiple of 128


# ----------------------------- Pallas kernel ------------------------------
def fused_kernel(p_ref, q_ref,
                 wbig_ref, cbias_ref,
                 lw_ref, lb_ref,
                 w1_ref, b1_ref, w2_ref, b2_ref, w3_ref, b3_ref,
                 cw1a_ref, cw1b_ref, cb1_ref, cw2_ref, cb2_ref, cw3_ref, cb3_ref,
                 o_ref):
    """Whole PureCNN forward (eval mode) in one kernel.

    p_ref  : (4*BP, KP)  im2col patches, rows ordered (pool_offset, batch),
                         cols ordered (ph, pw, c*k*k) with zero lane padding
    q_ref  : (BP, P)     question, zero-padded
    wbig   : (KP, P)     block-diagonal conv weight (one block per pooled pos)
    cbias  : (1, P)      conv bias tiled over the 54 real output features
    other refs: lane/sublane zero-padded dense weights/biases
    o_ref  : (BP, P)     padded output; real result is [:B, :OUT_SIZE]
    """
    f32 = jnp.float32
    # Conv2d(3,6,5,stride=2) for all 4 pool offsets as ONE MXU matmul.
    conv = jnp.dot(p_ref[...], wbig_ref[...], preferred_element_type=f32)    # (4*BP, P)
    # MaxPool2d(2): max over the 4 offset row-groups (8-row aligned slices).
    pooled = jnp.maximum(jnp.maximum(conv[0 * BP:1 * BP], conv[1 * BP:2 * BP]),
                         jnp.maximum(conv[2 * BP:3 * BP], conv[3 * BP:4 * BP]))
    # Bias + ReLU hoisted past the max (bias shared across offsets, ReLU monotone).
    feat = jnp.maximum(pooled + cbias_ref[...], 0.0)                         # (BP, P)
    # CNNNetwork.mlp: LazyLinear(54 -> 32)
    out_cnn = jnp.dot(feat, lw_ref[...], preferred_element_type=f32) + lb_ref[...]
    # MLP(question): 9 -> 16 -> 8 -> 16 (Dropout = identity in eval)
    h = jnp.maximum(jnp.dot(q_ref[...], w1_ref[...], preferred_element_type=f32) + b1_ref[...], 0.0)
    h = jnp.maximum(jnp.dot(h, w2_ref[...], preferred_element_type=f32) + b2_ref[...], 0.0)
    out_mlp = jnp.dot(h, w3_ref[...], preferred_element_type=f32) + b3_ref[...]
    # Combine: cat(out_cnn, out_mlp) @ W1 done as split matmuls (no in-kernel concat)
    z = (jnp.dot(out_cnn, cw1a_ref[...], preferred_element_type=f32)
         + jnp.dot(out_mlp, cw1b_ref[...], preferred_element_type=f32) + cb1_ref[...])
    z = jnp.maximum(z, 0.0)
    z = jnp.maximum(jnp.dot(z, cw2_ref[...], preferred_element_type=f32) + cb2_ref[...], 0.0)
    o_ref[...] = jnp.dot(z, cw3_ref[...], preferred_element_type=f32) + cb3_ref[...]


# ------------------------------- JAX glue ---------------------------------
def full_spec(shape):
    """Whole-array block, single grid point."""
    n = len(shape)
    return pl.BlockSpec(tuple(shape), lambda i, n=n: (0,) * n)


def extract_pool_patches(imgp):
    """(BP, CIN, H, W) -> (4*BP, KP) im2col patches, one XLA patch-extraction op.

    Row index = (2*dy + dx) * BP + b  (the 4 corners of each 2x2 pool window),
    column index = (ph*PW + pw) * CKK + k  (matches the block-diagonal weight)."""
    p = jax.lax.conv_general_dilated_patches(
        imgp, filter_shape=(K, K), window_strides=(STRIDE, STRIDE),
        padding="VALID", precision=jax.lax.Precision.HIGHEST)          # (BP, CKK, OH, OW)
    p = p.reshape(BP, CKK, PH, 2, PH, 2)                               # split 2x2 pool windows
    p = p.transpose(3, 5, 0, 2, 4, 1)                                  # (dy, dx, b, ph, pw, ckk)
    p = p.reshape(4 * BP, S * CKK)                                     # (32, 675)
    return jnp.pad(p, ((0, 0), (0, KP - S * CKK)))                     # (32, 768)


def pure_cnn_forward(img, question, params):
    # Pad batch to 8 sublanes and question features to 128 lanes (zeros).
    imgp = jnp.pad(img, ((0, BP - B), (0, 0), (0, 0), (0, 0)))
    qp = jnp.pad(question, ((0, BP - B), (0, P - Q_IN)))
    patches = extract_pool_patches(imgp)                               # (4*BP, KP)

    args = (patches, qp,
            params["wbig"], params["cbias"],
            params["lazy_w"], params["lazy_b"],
            params["w1"], params["b1"], params["w2"], params["b2"],
            params["w3"], params["b3"],
            params["cw1a"], params["cw1b"], params["cb1"],
            params["cw2"], params["cb2"], params["cw3"], params["cb3"])

    out = pl.pallas_call(
        fused_kernel,
        grid=(1,),
        in_specs=[full_spec(a.shape) for a in args],
        out_specs=full_spec((BP, P)),
        out_shape=jax.ShapeDtypeStruct((BP, P), jnp.float32),
        compiler_params=pltpu.CompilerParams(dimension_semantics=("arbitrary",)),
    )(*args)
    return out[:B, :OUT_SIZE]


def init_params(key):
    ks = jax.random.split(key, 17)

    def rnd(k, shape, scale=0.1):
        return scale * jax.random.normal(k, shape, dtype=jnp.float32)

    def pad2(x, rows, cols):
        return jnp.pad(x, ((0, rows - x.shape[0]), (0, cols - x.shape[1])))

    # Conv2d(3, 6, 5): weight flattened to (CIN*K*K, COUT); bias (1, COUT)
    conv_w = rnd(ks[0], (CKK, COUT))
    conv_b = rnd(ks[1], (1, COUT))
    # Block-diagonal conv weight: (4*BP, KP) @ (KP, P) yields the conv output
    # already flattened per batch row in (ph, pw, c) order.
    wbig = pad2(block_diag(*([conv_w] * S)), KP, P)                    # (768, 128)
    cbias = pad2(jnp.tile(conv_b, (1, S)), 1, P)                       # (1, 128)

    return {
        "wbig": wbig, "cbias": cbias,
        # LazyLinear(54 -> 32)
        "lazy_w": pad2(rnd(ks[2], (FLAT, CNN_OUT)), P, P),
        "lazy_b": pad2(rnd(ks[3], (1, CNN_OUT)), 1, P),
        # MLP: 9 -> 16 -> 8 -> 16
        "w1": pad2(rnd(ks[4], (Q_IN, 16)), P, P), "b1": pad2(rnd(ks[5], (1, 16)), 1, P),
        "w2": pad2(rnd(ks[6], (16, 8)), P, P),    "b2": pad2(rnd(ks[7], (1, 8)), 1, P),
        "w3": pad2(rnd(ks[8], (8, MLP_OUT)), P, P), "b3": pad2(rnd(ks[9], (1, MLP_OUT)), 1, P),
        # Combine: (32+16) -> 128 -> 32 -> OUT_SIZE (first weight split in two)
        "cw1a": pad2(rnd(ks[10], (CNN_OUT, 128)), P, P),
        "cw1b": pad2(rnd(ks[11], (MLP_OUT, 128)), P, P),
        "cb1": pad2(rnd(ks[12], (1, 128)), 1, P),
        "cw2": pad2(rnd(ks[13], (128, 32)), P, P), "cb2": pad2(rnd(ks[14], (1, 32)), 1, P),
        "cw3": pad2(rnd(ks[15], (32, OUT_SIZE)), P, P),
        "cb3": pad2(rnd(ks[16], (1, OUT_SIZE)), 1, P),
    }


if __name__ == "__main__":
    key = jax.random.PRNGKey(0)
    k_img, k_q, k_p = jax.random.split(key, 3)
    img = jax.random.normal(k_img, (B, CIN, H, W), dtype=jnp.float32)        # NCHW
    question = jax.random.normal(k_q, (B, Q_IN), dtype=jnp.float32)
    params = init_params(k_p)

    forward = jax.jit(pure_cnn_forward)
    out = jax.block_until_ready(forward(img, question, params))
    assert out.shape == (B, OUT_SIZE) and out.dtype == jnp.float32
    print("KERNEL_OK")
</pallas_src>

<mosaic_0001>
module attributes {stable_mosaic.version = 11 : i64} {
  func.func @fused_kernel(%arg0: i32, %arg1: memref<32x768xf32, #tpu.memory_space<vmem>>, %arg2: memref<8x128xf32, #tpu.memory_space<vmem>>, %arg3: memref<768x128xf32, #tpu.memory_space<vmem>>, %arg4: memref<1x128xf32, #tpu.memory_space<vmem>>, %arg5: memref<128x128xf32, #tpu.memory_space<vmem>>, %arg6: memref<1x128xf32, #tpu.memory_space<vmem>>, %arg7: memref<128x128xf32, #tpu.memory_space<vmem>>, %arg8: memref<1x128xf32, #tpu.memory_space<vmem>>, %arg9: memref<128x128xf32, #tpu.memory_space<vmem>>, %arg10: memref<1x128xf32, #tpu.memory_space<vmem>>, %arg11: memref<128x128xf32, #tpu.memory_space<vmem>>, %arg12: memref<1x128xf32, #tpu.memory_space<vmem>>, %arg13: memref<128x128xf32, #tpu.memory_space<vmem>>, %arg14: memref<128x128xf32, #tpu.memory_space<vmem>>, %arg15: memref<1x128xf32, #tpu.memory_space<vmem>>, %arg16: memref<128x128xf32, #tpu.memory_space<vmem>>, %arg17: memref<1x128xf32, #tpu.memory_space<vmem>>, %arg18: memref<128x128xf32, #tpu.memory_space<vmem>>, %arg19: memref<1x128xf32, #tpu.memory_space<vmem>>, %arg20: memref<8x128xf32, #tpu.memory_space<vmem>>) attributes {dimension_semantics = [#tpu.dimension_semantics<arbitrary>], iteration_bounds = array<i64: 1>, scalar_prefetch = 0 : i64, scratch_operands = 0 : i64, tpu.core_type = #tpu.core_type<tc>, window_params = [{pipeline_mode = #tpu.pipeline_mode<synchronous>, transform_indices = @transform_0, window_bounds = array<i64: 32, 768>}, {pipeline_mode = #tpu.pipeline_mode<synchronous>, transform_indices = @transform_1, window_bounds = array<i64: 8, 128>}, {pipeline_mode = #tpu.pipeline_mode<synchronous>, transform_indices = @transform_2, window_bounds = array<i64: 768, 128>}, {pipeline_mode = #tpu.pipeline_mode<synchronous>, transform_indices = @transform_3, window_bounds = array<i64: 1, 128>}, {pipeline_mode = #tpu.pipeline_mode<synchronous>, transform_indices = @transform_4, window_bounds = array<i64: 128, 128>}, {pipeline_mode = #tpu.pipeline_mode<synchronous>, transform_indices = @transform_5, window_bounds = array<i64: 1, 128>}, {pipeline_mode = #tpu.pipeline_mode<synchronous>, transform_indices = @transform_6, window_bounds = array<i64: 128, 128>}, {pipeline_mode = #tpu.pipeline_mode<synchronous>, transform_indices = @transform_7, window_bounds = array<i64: 1, 128>}, {pipeline_mode = #tpu.pipeline_mode<synchronous>, transform_indices = @transform_8, window_bounds = array<i64: 128, 128>}, {pipeline_mode = #tpu.pipeline_mode<synchronous>, transform_indices = @transform_9, window_bounds = array<i64: 1, 128>}, {pipeline_mode = #tpu.pipeline_mode<synchronous>, transform_indices = @transform_10, window_bounds = array<i64: 128, 128>}, {pipeline_mode = #tpu.pipeline_mode<synchronous>, transform_indices = @transform_11, window_bounds = array<i64: 1, 128>}, {pipeline_mode = #tpu.pipeline_mode<synchronous>, transform_indices = @transform_12, window_bounds = array<i64: 128, 128>}, {pipeline_mode = #tpu.pipeline_mode<synchronous>, transform_indices = @transform_13, window_bounds = array<i64: 128, 128>}, {pipeline_mode = #tpu.pipeline_mode<synchronous>, transform_indices = @transform_14, window_bounds = array<i64: 1, 128>}, {pipeline_mode = #tpu.pipeline_mode<synchronous>, transform_indices = @transform_15, window_bounds = array<i64: 128, 128>}, {pipeline_mode = #tpu.pipeline_mode<synchronous>, transform_indices = @transform_16, window_bounds = array<i64: 1, 128>}, {pipeline_mode = #tpu.pipeline_mode<synchronous>, transform_indices = @transform_17, window_bounds = array<i64: 128, 128>}, {pipeline_mode = #tpu.pipeline_mode<synchronous>, transform_indices = @transform_18, window_bounds = array<i64: 1, 128>}, {pipeline_mode = #tpu.pipeline_mode<synchronous>, transform_indices = @transform_19, window_bounds = array<i64: 8, 128>}]} {
    %c0 = arith.constant 0 : index
    %c0_0 = arith.constant 0 : index
    %0 = vector.load %arg1[%c0, %c0_0] : memref<32x768xf32, #tpu.memory_space<vmem>>, vector<32x768xf32>
    %c0_1 = arith.constant 0 : index
    %c0_2 = arith.constant 0 : index
    %1 = vector.load %arg3[%c0_1, %c0_2] : memref<768x128xf32, #tpu.memory_space<vmem>>, vector<768x128xf32>
    %cst = arith.constant dense<0.000000e+00> : vector<32x128xf32>
    %2 = tpu.matmul %0, %1, %cst {dimension_numbers = #tpu.dot_dimension_numbers<[1], [0], [0], [1], [0, 0, 1, 1], [], []>} : vector<32x768xf32>, vector<768x128xf32>, vector<32x128xf32> -> vector<32x128xf32>
    %3 = vector.extract_strided_slice %2 {offsets = [0, 0], sizes = [8, 128], strides = [1, 1]} : vector<32x128xf32> to vector<8x128xf32>
    %4 = vector.extract_strided_slice %2 {offsets = [8, 0], sizes = [8, 128], strides = [1, 1]} : vector<32x128xf32> to vector<8x128xf32>
    %5 = arith.maximumf %3, %4 : vector<8x128xf32>
    %6 = vector.extract_strided_slice %2 {offsets = [16, 0], sizes = [8, 128], strides = [1, 1]} : vector<32x128xf32> to vector<8x128xf32>
    %7 = vector.extract_strided_slice %2 {offsets = [24, 0], sizes = [8, 128], strides = [1, 1]} : vector<32x128xf32> to vector<8x128xf32>
    %8 = arith.maximumf %6, %7 : vector<8x128xf32>
    %9 = arith.maximumf %5, %8 : vector<8x128xf32>
    %c0_3 = arith.constant 0 : index
    %c0_4 = arith.constant 0 : index
    %10 = vector.load %arg4[%c0_3, %c0_4] : memref<1x128xf32, #tpu.memory_space<vmem>>, vector<1x128xf32>
    %11 = vector.broadcast %10 : vector<1x128xf32> to vector<8x128xf32>
    %12 = arith.addf %9, %11 : vector<8x128xf32>
    %cst_5 = arith.constant 0.000000e+00 : f32
    %13 = vector.broadcast %cst_5 : f32 to vector<8x128xf32>
    %14 = arith.maximumf %12, %13 : vector<8x128xf32>
    %c0_6 = arith.constant 0 : index
    %c0_7 = arith.constant 0 : index
    %15 = vector.load %arg5[%c0_6, %c0_7] : memref<128x128xf32, #tpu.memory_space<vmem>>, vector<128x128xf32>
    %cst_8 = arith.constant dense<0.000000e+00> : vector<8x128xf32>
    %16 = tpu.matmul %14, %15, %cst_8 {dimension_numbers = #tpu.dot_dimension_numbers<[1], [0], [0], [1], [0, 0, 1, 1], [], []>} : vector<8x128xf32>, vector<128x128xf32>, vector<8x128xf32> -> vector<8x128xf32>
    %c0_9 = arith.constant 0 : index
    %c0_10 = arith.constant 0 : index
    %17 = vector.load %arg6[%c0_9, %c0_10] : memref<1x128xf32, #tpu.memory_space<vmem>>, vector<1x128xf32>
    %18 = vector.broadcast %17 : vector<1x128xf32> to vector<8x128xf32>
    %19 = arith.addf %16, %18 : vector<8x128xf32>
    %c0_11 = arith.constant 0 : index
    %c0_12 = arith.constant 0 : index
    %20 = vector.load %arg2[%c0_11, %c0_12] : memref<8x128xf32, #tpu.memory_space<vmem>>, vector<8x128xf32>
    %c0_13 = arith.constant 0 : index
    %c0_14 = arith.constant 0 : index
    %21 = vector.load %arg7[%c0_13, %c0_14] : memref<128x128xf32, #tpu.memory_space<vmem>>, vector<128x128xf32>
    %cst_15 = arith.constant dense<0.000000e+00> : vector<8x128xf32>
    %22 = tpu.matmul %20, %21, %cst_15 {dimension_numbers = #tpu.dot_dimension_numbers<[1], [0], [0], [1], [0, 0, 1, 1], [], []>} : vector<8x128xf32>, vector<128x128xf32>, vector<8x128xf32> -> vector<8x128xf32>
    %c0_16 = arith.constant 0 : index
    %c0_17 = arith.constant 0 : index
    %23 = vector.load %arg8[%c0_16, %c0_17] : memref<1x128xf32, #tpu.memory_space<vmem>>, vector<1x128xf32>
    %24 = vector.broadcast %23 : vector<1x128xf32> to vector<8x128xf32>
    %25 = arith.addf %22, %24 : vector<8x128xf32>
    %cst_18 = arith.constant 0.000000e+00 : f32
    %26 = vector.broadcast %cst_18 : f32 to vector<8x128xf32>
    %27 = arith.maximumf %25, %26 : vector<8x128xf32>
    %c0_19 = arith.constant 0 : index
    %c0_20 = arith.constant 0 : index
    %28 = vector.load %arg9[%c0_19, %c0_20] : memref<128x128xf32, #tpu.memory_space<vmem>>, vector<128x128xf32>
    %cst_21 = arith.constant dense<0.000000e+00> : vector<8x128xf32>
    %29 = tpu.matmul %27, %28, %cst_21 {dimension_numbers = #tpu.dot_dimension_numbers<[1], [0], [0], [1], [0, 0, 1, 1], [], []>} : vector<8x128xf32>, vector<128x128xf32>, vector<8x128xf32> -> vector<8x128xf32>
    %c0_22 = arith.constant 0 : index
    %c0_23 = arith.constant 0 : index
    %30 = vector.load %arg10[%c0_22, %c0_23] : memref<1x128xf32, #tpu.memory_space<vmem>>, vector<1x128xf32>
    %31 = vector.broadcast %30 : vector<1x128xf32> to vector<8x128xf32>
    %32 = arith.addf %29, %31 : vector<8x128xf32>
    %cst_24 = arith.constant 0.000000e+00 : f32
    %33 = vector.broadcast %cst_24 : f32 to vector<8x128xf32>
    %34 = arith.maximumf %32, %33 : vector<8x128xf32>
    %c0_25 = arith.constant 0 : index
    %c0_26 = arith.constant 0 : index
    %35 = vector.load %arg11[%c0_25, %c0_26] : memref<128x128xf32, #tpu.memory_space<vmem>>, vector<128x128xf32>
    %cst_27 = arith.constant dense<0.000000e+00> : vector<8x128xf32>
    %36 = tpu.matmul %34, %35, %cst_27 {dimension_numbers = #tpu.dot_dimension_numbers<[1], [0], [0], [1], [0, 0, 1, 1], [], []>} : vector<8x128xf32>, vector<128x128xf32>, vector<8x128xf32> -> vector<8x128xf32>
    %c0_28 = arith.constant 0 : index
    %c0_29 = arith.constant 0 : index
    %37 = vector.load %arg12[%c0_28, %c0_29] : memref<1x128xf32, #tpu.memory_space<vmem>>, vector<1x128xf32>
    %38 = vector.broadcast %37 : vector<1x128xf32> to vector<8x128xf32>
    %39 = arith.addf %36, %38 : vector<8x128xf32>
    %c0_30 = arith.constant 0 : index
    %c0_31 = arith.constant 0 : index
    %40 = vector.load %arg13[%c0_30, %c0_31] : memref<128x128xf32, #tpu.memory_space<vmem>>, vector<128x128xf32>
    %cst_32 = arith.constant dense<0.000000e+00> : vector<8x128xf32>
    %41 = tpu.matmul %19, %40, %cst_32 {dimension_numbers = #tpu.dot_dimension_numbers<[1], [0], [0], [1], [0, 0, 1, 1], [], []>} : vector<8x128xf32>, vector<128x128xf32>, vector<8x128xf32> -> vector<8x128xf32>
    %c0_33 = arith.constant 0 : index
    %c0_34 = arith.constant 0 : index
    %42 = vector.load %arg14[%c0_33, %c0_34] : memref<128x128xf32, #tpu.memory_space<vmem>>, vector<128x128xf32>
    %cst_35 = arith.constant dense<0.000000e+00> : vector<8x128xf32>
    %43 = tpu.matmul %39, %42, %cst_35 {dimension_numbers = #tpu.dot_dimension_numbers<[1], [0], [0], [1], [0, 0, 1, 1], [], []>} : vector<8x128xf32>, vector<128x128xf32>, vector<8x128xf32> -> vector<8x128xf32>
    %44 = arith.addf %41, %43 : vector<8x128xf32>
    %c0_36 = arith.constant 0 : index
    %c0_37 = arith.constant 0 : index
    %45 = vector.load %arg15[%c0_36, %c0_37] : memref<1x128xf32, #tpu.memory_space<vmem>>, vector<1x128xf32>
    %46 = vector.broadcast %45 : vector<1x128xf32> to vector<8x128xf32>
    %47 = arith.addf %44, %46 : vector<8x128xf32>
    %cst_38 = arith.constant 0.000000e+00 : f32
    %48 = vector.broadcast %cst_38 : f32 to vector<8x128xf32>
    %49 = arith.maximumf %47, %48 : vector<8x128xf32>
    %c0_39 = arith.constant 0 : index
    %c0_40 = arith.constant 0 : index
    %50 = vector.load %arg16[%c0_39, %c0_40] : memref<128x128xf32, #tpu.memory_space<vmem>>, vector<128x128xf32>
    %cst_41 = arith.constant dense<0.000000e+00> : vector<8x128xf32>
    %51 = tpu.matmul %49, %50, %cst_41 {dimension_numbers = #tpu.dot_dimension_numbers<[1], [0], [0], [1], [0, 0, 1, 1], [], []>} : vector<8x128xf32>, vector<128x128xf32>, vector<8x128xf32> -> vector<8x128xf32>
    %c0_42 = arith.constant 0 : index
    %c0_43 = arith.constant 0 : index
    %52 = vector.load %arg17[%c0_42, %c0_43] : memref<1x128xf32, #tpu.memory_space<vmem>>, vector<1x128xf32>
    %53 = vector.broadcast %52 : vector<1x128xf32> to vector<8x128xf32>
    %54 = arith.addf %51, %53 : vector<8x128xf32>
    %cst_44 = arith.constant 0.000000e+00 : f32
    %55 = vector.broadcast %cst_44 : f32 to vector<8x128xf32>
    %56 = arith.maximumf %54, %55 : vector<8x128xf32>
    %c0_45 = arith.constant 0 : index
    %c0_46 = arith.constant 0 : index
    %57 = vector.load %arg18[%c0_45, %c0_46] : memref<128x128xf32, #tpu.memory_space<vmem>>, vector<128x128xf32>
    %cst_47 = arith.constant dense<0.000000e+00> : vector<8x128xf32>
    %58 = tpu.matmul %56, %57, %cst_47 {dimension_numbers = #tpu.dot_dimension_numbers<[1], [0], [0], [1], [0, 0, 1, 1], [], []>} : vector<8x128xf32>, vector<128x128xf32>, vector<8x128xf32> -> vector<8x128xf32>
    %c0_48 = arith.constant 0 : index
    %c0_49 = arith.constant 0 : index
    %59 = vector.load %arg19[%c0_48, %c0_49] : memref<1x128xf32, #tpu.memory_space<vmem>>, vector<1x128xf32>
    %60 = vector.broadcast %59 : vector<1x128xf32> to vector<8x128xf32>
    %61 = arith.addf %58, %60 : vector<8x128xf32>
    %c0_50 = arith.constant 0 : index
    %c0_51 = arith.constant 0 : index
    %62 = vector.load %arg20[%c0_50, %c0_51] : memref<8x128xf32, #tpu.memory_space<vmem>>, vector<8x128xf32>
    tpu.vector_store %arg20[%c0_50, %c0_51], %61 {strides = array<i32>} : memref<8x128xf32, #tpu.memory_space<vmem>>, vector<8x128xf32>,
    return
  }
  func.func @transform_0(%arg0: i32) -> (i32, i32) {
    %c0_i32 = arith.constant 0 : i32
    %c0_i32_0 = arith.constant 0 : i32
    %c0_i32_1 = arith.constant 0 : i32
    return %c0_i32, %c0_i32_0 : i32, i32
  }
  func.func @transform_1(%arg0: i32) -> (i32, i32) {
    %c0_i32 = arith.constant 0 : i32
    %c0_i32_0 = arith.constant 0 : i32
    %c0_i32_1 = arith.constant 0 : i32
    return %c0_i32, %c0_i32_0 : i32, i32
  }
  func.func @transform_2(%arg0: i32) -> (i32, i32) {
    %c0_i32 = arith.constant 0 : i32
    %c0_i32_0 = arith.constant 0 : i32
    %c0_i32_1 = arith.constant 0 : i32
    return %c0_i32, %c0_i32_0 : i32, i32
  }
  func.func @transform_3(%arg0: i32) -> (i32, i32) {
    %c0_i32 = arith.constant 0 : i32
    %c0_i32_0 = arith.constant 0 : i32
    %c0_i32_1 = arith.constant 0 : i32
    return %c0_i32, %c0_i32_0 : i32, i32
  }
  func.func @transform_4(%arg0: i32) -> (i32, i32) {
    %c0_i32 = arith.constant 0 : i32
    %c0_i32_0 = arith.constant 0 : i32
    %c0_i32_1 = arith.constant 0 : i32
    return %c0_i32, %c0_i32_0 : i32, i32
  }
  func.func @transform_5(%arg0: i32) -> (i32, i32) {
    %c0_i32 = arith.constant 0 : i32
    %c0_i32_0 = arith.constant 0 : i32
    %c0_i32_1 = arith.constant 0 : i32
    return %c0_i32, %c0_i32_0 : i32, i32
  }
  func.func @transform_6(%arg0: i32) -> (i32, i32) {
    %c0_i32 = arith.constant 0 : i32
    %c0_i32_0 = arith.constant 0 : i32
    %c0_i32_1 = arith.constant 0 : i32
    return %c0_i32, %c0_i32_0 : i32, i32
  }
  func.func @transform_7(%arg0: i32) -> (i32, i32) {
    %c0_i32 = arith.constant 0 : i32
    %c0_i32_0 = arith.constant 0 : i32
    %c0_i32_1 = arith.constant 0 : i32
    return %c0_i32, %c0_i32_0 : i32, i32
  }
  func.func @transform_8(%arg0: i32) -> (i32, i32) {
    %c0_i32 = arith.constant 0 : i32
    %c0_i32_0 = arith.constant 0 : i32
    %c0_i32_1 = arith.constant 0 : i32
    return %c0_i32, %c0_i32_0 : i32, i32
  }
  func.func @transform_9(%arg0: i32) -> (i32, i32) {
    %c0_i32 = arith.constant 0 : i32
    %c0_i32_0 = arith.constant 0 : i32
    %c0_i32_1 = arith.constant 0 : i32
    return %c0_i32, %c0_i32_0 : i32, i32
  }
  func.func @transform_10(%arg0: i32) -> (i32, i32) {
    %c0_i32 = arith.constant 0 : i32
    %c0_i32_0 = arith.constant 0 : i32
    %c0_i32_1 = arith.constant 0 : i32
    return %c0_i32, %c0_i32_0 : i32, i32
  }
  func.func @transform_11(%arg0: i32) -> (i32, i32) {
    %c0_i32 = arith.constant 0 : i32
    %c0_i32_0 = arith.constant 0 : i32
    %c0_i32_1 = arith.constant 0 : i32
    return %c0_i32, %c0_i32_0 : i32, i32
  }
  func.func @transform_12(%arg0: i32) -> (i32, i32) {
    %c0_i32 = arith.constant 0 : i32
    %c0_i32_0 = arith.constant 0 : i32
    %c0_i32_1 = arith.constant 0 : i32
    return %c0_i32, %c0_i32_0 : i32, i32
  }
  func.func @transform_13(%arg0: i32) -> (i32, i32) {
    %c0_i32 = arith.constant 0 : i32
    %c0_i32_0 = arith.constant 0 : i32
    %c0_i32_1 = arith.constant 0 : i32
    return %c0_i32, %c0_i32_0 : i32, i32
  }
  func.func @transform_14(%arg0: i32) -> (i32, i32) {
    %c0_i32 = arith.constant 0 : i32
    %c0_i32_0 = arith.constant 0 : i32
    %c0_i32_1 = arith.constant 0 : i32
    return %c0_i32, %c0_i32_0 : i32, i32
  }
  func.func @transform_15(%arg0: i32) -> (i32, i32) {
    %c0_i32 = arith.constant 0 : i32
    %c0_i32_0 = arith.constant 0 : i32
    %c0_i32_1 = arith.constant 0 : i32
    return %c0_i32, %c0_i32_0 : i32, i32
  }
  func.func @transform_16(%arg0: i32) -> (i32, i32) {
    %c0_i32 = arith.constant 0 : i32
    %c0_i32_0 = arith.constant 0 : i32
    %c0_i32_1 = arith.constant 0 : i32
    return %c0_i32, %c0_i32_0 : i32, i32
  }
  func.func @transform_17(%arg0: i32) -> (i32, i32) {
    %c0_i32 = arith.constant 0 : i32
    %c0_i32_0 = arith.constant 0 : i32
    %c0_i32_1 = arith.constant 0 : i32
    return %c0_i32, %c0_i32_0 : i32, i32
  }
  func.func @transform_18(%arg0: i32) -> (i32, i32) {
    %c0_i32 = arith.constant 0 : i32
    %c0_i32_0 = arith.constant 0 : i32
    %c0_i32_1 = arith.constant 0 : i32
    return %c0_i32, %c0_i32_0 : i32, i32
  }
  func.func @transform_19(%arg0: i32) -> (i32, i32) {
    %c0_i32 = arith.constant 0 : i32
    %c0_i32_0 = arith.constant 0 : i32
    %c0_i32_1 = arith.constant 0 : i32
    return %c0_i32, %c0_i32_0 : i32, i32
  }
}

</mosaic_0001>

<bundles_post_ra>
// kernel: pure_cnn_forward.1
= control target key start
LH: loop header
LB: loop body
LE: loop exit
PB: predicated region body
PF: predicated region fallthrough
CT: control target
= control target key end

     0   :  { %vm2045_vm0 = vmmov 0   ;;  %s3001_s2 = inlined_call_operand.vmem [shape: f32[768,128], index: 2, kind: input, shape index: {}]   ;;  %s3002_s0 = inlined_call_operand.vmem [shape: f32[32,768], index: 0, kind: input, shape index: {}]   ;;  %s3003_s6 = inlined_call_operand.vmem [shape: f32[128,128], index: 6, kind: input, shape index: {}]   ;;  %s3004_s1 = inlined_call_operand.vmem [shape: f32[8,128], index: 1, kind: input, shape index: {}]   ;;  %s3005_s4 = inlined_call_operand.vmem [shape: f32[128,128], index: 4, kind: input, shape index: {}]   ;;  %s3006_s3 = inlined_call_operand.vmem [shape: f32[1,128], index: 3, kind: input, shape index: {}]   ;;  %s3007_s8 = inlined_call_operand.vmem [shape: f32[128,128], index: 8, kind: input, shape index: {}]   ;;  %s3008_s7 = inlined_call_operand.vmem [shape: f32[1,128], index: 7, kind: input, shape index: {}]   ;;  %s3009_s10 = inlined_call_operand.vmem [shape: f32[128,128], index: 10, kind: input, shape index: {}]   ;;  %s3010_s13 = inlined_call_operand.vmem [shape: f32[128,128], index: 13, kind: input, shape index: {}]   ;;  %s3011_s9 = inlined_call_operand.vmem [shape: f32[1,128], index: 9, kind: input, shape index: {}]   ;;  %s3012_s12 = inlined_call_operand.vmem [shape: f32[128,128], index: 12, kind: input, shape index: {}]   ;;  %s3013_s5 = inlined_call_operand.vmem [shape: f32[1,128], index: 5, kind: input, shape index: {}]   ;;  %s3014_s15 = inlined_call_operand.vmem [shape: f32[128,128], index: 15, kind: input, shape index: {}]   ;;  %s3015_s11 = inlined_call_operand.vmem [shape: f32[1,128], index: 11, kind: input, shape index: {}]   ;;  %s3016_s17 = inlined_call_operand.vmem [shape: f32[128,128], index: 17, kind: input, shape index: {}]   ;;  %s3017_s14 = inlined_call_operand.vmem [shape: f32[1,128], index: 14, kind: input, shape index: {}]   ;;  %s3018_s16 = inlined_call_operand.vmem [shape: f32[1,128], index: 16, kind: input, shape index: {}]   ;;  %s3019_s18 = inlined_call_operand.vmem [shape: f32[1,128], index: 18, kind: input, shape index: {}]   ;;  %s3020_s19 = inlined_call_operand.vmem [shape: f32[8,128], index: 19, kind: output, shape index: {}]  }
   0x1   :  { %3024 = sst [smem:[#allocation2_spill]] %s3001_s2 }
   0x2   :  { %3025 = sst [smem:[#allocation3_spill]] %s3002_s0  ;;  %s3028_s20 = sld [smem:[#allocation2_spill]] }
   0x3   :  { %3026 = sst [smem:[#allocation4_spill]] %s3003_s6  ;;  %s3029_s2 = sld [smem:[#allocation3_spill]] }
   0x4   :  { %3027 = sst [smem:[#allocation5_spill]] %s3004_s1  ;;  %s3030_s29 = sld [smem:[#allocation4_spill]] }
   0x8   :  { %v102_v0 = vld [vmem:[%s3028_s20 + $0x80] sm:$0xff]  ;;  %v103_v1 = vld [vmem:[%s3028_s20 + $0x88] sm:$0xff]  ;;  %v104_v11 = vld [vmem:[%s3028_s20 + $0x90] sm:$0xff] }
   0x9   :  { %v134_v2 = vld [vmem:[%s3028_s20 + $0x180] sm:$0xff]  ;;  %v1753_v3 = vpack.c.bf16 %v103_v1, %v102_v0  ;;  %v135_v4 = vld [vmem:[%s3028_s20 + $0x188] sm:$0xff]  ;;  %v105_v13 = vld [vmem:[%s3028_s20 + $0x98] sm:$0xff] }
   0xa   :  { %v86_v5 = vld [vmem:[%s3028_s20] sm:$0xff]  ;;  %v87_v6 = vld [vmem:[%s3028_s20 + $0x8] sm:$0xff]  ;;  %v1785_v7 = vpack.c.bf16 %v135_v4, %v134_v2  ;;  %v136_v14 = vld [vmem:[%s3028_s20 + $0x190] sm:$0xff]  ;;  %v1757_v16 = vpack.c.bf16 %v105_v13, %v104_v11 }
   0xb   :  { %v1755_v8 = vpack.c.bf16 %v87_v6, %v86_v5  ;;  %v118_v9 = vld [vmem:[%s3028_s20 + $0x100] sm:$0xff]  ;;  %v119_v10 = vld [vmem:[%s3028_s20 + $0x108] sm:$0xff]  ;;  %1754 = vmatprep.subr.bf16.mxu0 %v1753_v3  ;;  %v137_v15 = vld [vmem:[%s3028_s20 + $0x198] sm:$0xff] }
   0xc   :  { %v1787_v12 = vpack.c.bf16 %v119_v10, %v118_v9  ;;  %1786 = vmatprep.subr.bf16.mxu1 %v1785_v7  ;;  %v1789_v17 = vpack.c.bf16 %v137_v15, %v136_v14  ;;  %v88_v18 = vld [vmem:[%s3028_s20 + $0x10] sm:$0xff]  ;;  %v89_v19 = vld [vmem:[%s3028_s20 + $0x18] sm:$0xff]  ;;  %v106_v23 = vld [vmem:[%s3028_s20 + $0xa0] sm:$0xff] }
   0xd   :  { %1756 = vmatpush3.bf16.msra.mxu0 %v1755_v8  ;;  %v120_v20 = vld [vmem:[%s3028_s20 + $0x110] sm:$0xff]  ;;  %v1759_v21 = vpack.c.bf16 %v89_v19, %v88_v18  ;;  %v121_v22 = vld [vmem:[%s3028_s20 + $0x118] sm:$0xff]  ;;  %v107_v24 = vld [vmem:[%s3028_s20 + $0xa8] sm:$0xff] }
   0xe   :  { %1788 = vmatpush3.bf16.msra.mxu1 %v1787_v12  ;;  %1758 = vmatprep.subr.bf16.mxu0 %v1757_v16  ;;  %v1791_v25 = vpack.c.bf16 %v121_v22, %v120_v20  ;;  %v1761_v26 = vpack.c.bf16 %v107_v24, %v106_v23  ;;  %v138_v27 = vld [vmem:[%s3028_s20 + $0x1a0] sm:$0xff]  ;;  %v139_v28 = vld [vmem:[%s3028_s20 + $0x1a8] sm:$0xff]  ;;  %v108_v35 = vld [vmem:[%s3028_s20 + $0xb0] sm:$0xff] }
   0xf   :  { %1790 = vmatprep.subr.bf16.mxu1 %v1789_v17  ;;  %v90_v29 = vld [vmem:[%s3028_s20 + $0x20] sm:$0xff]  ;;  %v1793_v30 = vpack.c.bf16 %v139_v28, %v138_v27  ;;  %v91_v31 = vld [vmem:[%s3028_s20 + $0x28] sm:$0xff]  ;;  %v109_v36 = vld [vmem:[%s3028_s20 + $0xb8] sm:$0xff] }
  0x10   :  { %v122_v32 = vld [vmem:[%s3028_s20 + $0x120] sm:$0xff]  ;;  %v123_v33 = vld [vmem:[%s3028_s20 + $0x128] sm:$0xff]  ;;  %v1763_v34 = vpack.c.bf16 %v91_v31, %v90_v29  ;;  %v140_v37 = vld [vmem:[%s3028_s20 + $0x1b0] sm:$0xff]  ;;  %v1765_v39 = vpack.c.bf16 %v109_v36, %v108_v35 }
  0x11   :  { %1760 = vmatpush3.bf16.msra.mxu0 %v1759_v21  ;;  %v1795_v38 = vpack.c.bf16 %v123_v33, %v122_v32  ;;  %v141_v40 = vld [vmem:[%s3028_s20 + $0x1b8] sm:$0xff]  ;;  %v92_v41 = vld [vmem:[%s3028_s20 + $0x30] sm:$0xff]  ;;  %v110_v46 = vld [vmem:[%s3028_s20 + $0xc0] sm:$0xff] }
  0x12   :  { %1792 = vmatpush3.bf16.msra.mxu1 %v1791_v25  ;;  %1762 = vmatprep.subr.bf16.mxu0 %v1761_v26  ;;  %v93_v42 = vld [vmem:[%s3028_s20 + $0x38] sm:$0xff]  ;;  %v1797_v43 = vpack.c.bf16 %v141_v40, %v140_v37  ;;  %v124_v44 = vld [vmem:[%s3028_s20 + $0x130] sm:$0xff]  ;;  %v111_v47 = vld [vmem:[%s3028_s20 + $0xc8] sm:$0xff] }
  0x13   :  { %1794 = vmatprep.subr.bf16.mxu1 %v1793_v30  ;;  %v125_v45 = vld [vmem:[%s3028_s20 + $0x138] sm:$0xff]  ;;  %v142_v48 = vld [vmem:[%s3028_s20 + $0x1c0] sm:$0xff]  ;;  %v143_v49 = vld [vmem:[%s3028_s20 + $0x1c8] sm:$0xff]  ;;  %v1767_v50 = vpack.c.bf16 %v93_v42, %v92_v41  ;;  %v1769_v52 = vpack.c.bf16 %v111_v47, %v110_v46 }
  0x14   :  { %v1799_v51 = vpack.c.bf16 %v125_v45, %v124_v44  ;;  %v94_v53 = vld [vmem:[%s3028_s20 + $0x40] sm:$0xff]  ;;  %v95_v54 = vld [vmem:[%s3028_s20 + $0x48] sm:$0xff]  ;;  %v1801_v56 = vpack.c.bf16 %v143_v49, %v142_v48  ;;  %v112_v58 = vld [vmem:[%s3028_s20 + $0xd0] sm:$0xff] }
  0x15   :  { %1764 = vmatpush3.bf16.msra.mxu0 %v1763_v34  ;;  %v126_v55 = vld [vmem:[%s3028_s20 + $0x140] sm:$0xff]  ;;  %v127_v57 = vld [vmem:[%s3028_s20 + $0x148] sm:$0xff]  ;;  %v113_v59 = vld [vmem:[%s3028_s20 + $0xd8] sm:$0xff]  ;;  %v1771_v62 = vpack.c.bf16 %v95_v54, %v94_v53 }
  0x16   :  { %1796 = vmatpush3.bf16.msra.mxu1 %v1795_v38  ;;  %1766 = vmatprep.subr.bf16.mxu0 %v1765_v39  ;;  %v144_v60 = vld [vmem:[%s3028_s20 + $0x1d0] sm:$0xff]  ;;  %v145_v61 = vld [vmem:[%s3028_s20 + $0x1d8] sm:$0xff]  ;;  %v1803_v63 = vpack.c.bf16 %v127_v57, %v126_v55  ;;  %v1773_v0 = vpack.c.bf16 %v113_v59, %v112_v58  ;;  %v114_v6 = vld [vmem:[%s3028_s20 + $0xe0] sm:$0xff] }
  0x17   :  { %1798 = vmatprep.subr.bf16.mxu1 %v1797_v43  ;;  %v96_v1 = vld [vmem:[%s3028_s20 + $0x50] sm:$0xff]  ;;  %v97_v2 = vld [vmem:[%s3028_s20 + $0x58] sm:$0xff]  ;;  %v1805_v4 = vpack.c.bf16 %v145_v61, %v144_v60  ;;  %v115_v7 = vld [vmem:[%s3028_s20 + $0xe8] sm:$0xff] }
  0x18   :  { %v128_v3 = vld [vmem:[%s3028_s20 + $0x150] sm:$0xff]  ;;  %v129_v5 = vld [vmem:[%s3028_s20 + $0x158] sm:$0xff]  ;;  %v146_v8 = vld [vmem:[%s3028_s20 + $0x1e0] sm:$0xff]  ;;  %v1775_v10 = vpack.c.bf16 %v97_v2, %v96_v1  ;;  %v1777_v14 = vpack.c.bf16 %v115_v7, %v114_v6 }
  0x19   :  { %1768 = vmatpush3.bf16.msra.mxu0 %v1767_v50  ;;  %v147_v9 = vld [vmem:[%s3028_s20 + $0x1e8] sm:$0xff]  ;;  %v98_v11 = vld [vmem:[%s3028_s20 + $0x60] sm:$0xff]  ;;  %v1807_v13 = vpack.c.bf16 %v129_v5, %v128_v3  ;;  %v65_v17 = vld [vmem:[%s3029_s2 + $0x18] sm:$0xff]  ;;  %v2044_v50 = vmov 0.0|0.0  }
  0x1a   :  { %1800 = vmatpush3.bf16.msra.mxu1 %v1799_v51  ;;  %1770 = vmatprep.subr.bf16.mxu0 %v1769_v52  ;;  %v99_v12 = vld [vmem:[%s3028_s20 + $0x68] sm:$0xff]  ;;  %v130_v15 = vld [vmem:[%s3028_s20 + $0x160] sm:$0xff]  ;;  %v1809_v18 = vpack.c.bf16 %v147_v9, %v146_v8  ;;  %v116_v20 = vld [vmem:[%s3028_s20 + $0xf0] sm:$0xff] }
  0x1b   :  { %1802 = vmatprep.subr.bf16.mxu1 %v1801_v56  ;;  %v63_v16 = vld [vmem:[%s3029_s2 + $0x8] sm:$0xff]  ;;  %v117_v21 = vld [vmem:[%s3028_s20 + $0xf8] sm:$0xff]  ;;  %v148_v22 = vld [vmem:[%s3028_s20 + $0x1f0] sm:$0xff]  ;;  %331 = vmatprep.mubr.f32.mxu1 %v65_v17  ;;  %v1779_v24 = vpack.c.bf16 %v99_v12, %v98_v11 }
  0x1c   :  { %v131_v19 = vld [vmem:[%s3028_s20 + $0x168] sm:$0xff]  ;;  %246 = vmatprep.mubr.f32.mxu0 %v63_v16  ;;  %v149_v23 = vld [vmem:[%s3028_s20 + $0x1f8] sm:$0xff]  ;;  %v1781_v26 = vpack.c.bf16 %v117_v21, %v116_v20  ;;  %v100_v27 = vld [vmem:[%s3028_s20 + $0x70] sm:$0xff] }
  0x1d   :  { %1772 = vmatpush3.bf16.msra.mxu0 %v1771_v62  ;;  %v1811_v25 = vpack.c.bf16 %v131_v19, %v130_v15  ;;  %v101_v28 = vld [vmem:[%s3028_s20 + $0x78] sm:$0xff]  ;;  %v132_v29 = vld [vmem:[%s3028_s20 + $0x170] sm:$0xff]  ;;  %v1813_v30 = vpack.c.bf16 %v149_v23, %v148_v22  ;;  %v166_v32 = vld [vmem:[%s3028_s20 + $0x280] sm:$0xff]  ;;  %v2046_v23 = vmov 0.0  }
  0x1e   :  { %1804 = vmatpush3.bf16.msra.mxu1 %v1803_v63  ;;  %1774 = vmatprep.subr.bf16.mxu0 %v1773_v0  ;;  %v133_v31 = vld [vmem:[%s3028_s20 + $0x178] sm:$0xff]  ;;  %v167_v33 = vld [vmem:[%s3028_s20 + $0x288] sm:$0xff]  ;;  %v1783_v34 = vpack.c.bf16 %v101_v28, %v100_v27  ;;  %v150_v37 = vld [vmem:[%s3028_s20 + $0x200] sm:$0xff] }
  0x1f   :  { %1806 = vmatprep.subr.bf16.mxu1 %v1805_v4  ;;  %v1815_v35 = vpack.c.bf16 %v133_v31, %v132_v29  ;;  %v1817_v36 = vpack.c.bf16 %v167_v33, %v166_v32  ;;  %v151_v38 = vld [vmem:[%s3028_s20 + $0x208] sm:$0xff]  ;;  %v168_v39 = vld [vmem:[%s3028_s20 + $0x290] sm:$0xff]  ;;  %v169_v40 = vld [vmem:[%s3028_s20 + $0x298] sm:$0xff] }
  0x20   :  { %v62_v41 = vld [vmem:[%s3029_s2] sm:$0xff]  ;;  %v1819_v42 = vpack.c.bf16 %v151_v38, %v150_v37  ;;  %v64_v43 = vld [vmem:[%s3029_s2 + $0x10] sm:$0xff]  ;;  %v1821_v44 = vpack.c.bf16 %v169_v40, %v168_v39  ;;  %v153_v46 = vld [vmem:[%s3028_s20 + $0x218] sm:$0xff] }
  0x21   :  { %1776 = vmatpush3.bf16.msra.mxu0 %v1775_v10  ;;  %v152_v45 = vld [vmem:[%s3028_s20 + $0x210] sm:$0xff]  ;;  %v170_v47 = vld [vmem:[%s3028_s20 + $0x2a0] sm:$0xff]  ;;  %v171_v48 = vld [vmem:[%s3028_s20 + $0x2a8] sm:$0xff] }
  0x22   :  { %1808 = vmatpush3.bf16.msra.mxu1 %v1807_v13  ;;  %1778 = vmatprep.subr.bf16.mxu0 %v1777_v14  ;;  %v69_v49 = vld [vmem:[%s3029_s2 + $0x38] sm:$0xff]  ;;  %v71_v51 = vld [vmem:[%s3029_s2 + $0x48] sm:$0xff]  ;;  %v1823_v52 = vpack.c.bf16 %v153_v46, %v152_v45  ;;  %v68_v53 = vld [vmem:[%s3029_s2 + $0x30] sm:$0xff]  ;;  %v1825_v54 = vpack.c.bf16 %v171_v48, %v170_v47 }
  0x23   :  { %1810 = vmatprep.subr.bf16.mxu1 %v1809_v18  ;;  %v154_v55 = vld [vmem:[%s3028_s20 + $0x220] sm:$0xff]  ;;  %v155_v56 = vld [vmem:[%s3028_s20 + $0x228] sm:$0xff]  ;;  %v172_v58 = vld [vmem:[%s3028_s20 + $0x2b0] sm:$0xff] }
  0x24   :  { %v70_v57 = vld [vmem:[%s3029_s2 + $0x40] sm:$0xff]  ;;  %v173_v59 = vld [vmem:[%s3028_s20 + $0x2b8] sm:$0xff]  ;;  %v75_v60 = vld [vmem:[%s3029_s2 + $0x68] sm:$0xff]  ;;  %v1827_v62 = vpack.c.bf16 %v155_v56, %v154_v55 }
  0x25   :  { %1780 = vmatpush3.bf16.msra.mxu0 %v1779_v24  ;;  %v77_v61 = vld [vmem:[%s3029_s2 + $0x78] sm:$0xff]  ;;  %v74_v63 = vld [vmem:[%s3029_s2 + $0x60] sm:$0xff]  ;;  %v1829_v0 = vpack.c.bf16 %v173_v59, %v172_v58  ;;  %v156_v1 = vld [vmem:[%s3028_s20 + $0x230] sm:$0xff] }
  0x26   :  { %1812 = vmatpush3.bf16.msra.mxu1 %v1811_v25  ;;  %1782 = vmatprep.subr.bf16.mxu0 %v1781_v26  ;;  %v157_v2 = vld [vmem:[%s3028_s20 + $0x238] sm:$0xff]  ;;  %v76_v3 = vld [vmem:[%s3029_s2 + $0x70] sm:$0xff]  ;;  %v174_v4 = vld [vmem:[%s3028_s20 + $0x2c0] sm:$0xff] }
  0x27   :  { %1814 = vmatprep.subr.bf16.mxu1 %v1813_v30  ;;  %v175_v5 = vld [vmem:[%s3028_s20 + $0x2c8] sm:$0xff]  ;;  %v81_v6 = vld [vmem:[%s3029_s2 + $0x98] sm:$0xff]  ;;  %v1831_v8 = vpack.c.bf16 %v157_v2, %v156_v1  ;;  %v80_v9 = vld [vmem:[%s3029_s2 + $0x90] sm:$0xff] }
  0x28   :  { %v83_v7 = vld [vmem:[%s3029_s2 + $0xa8] sm:$0xff]  ;;  %v1833_v10 = vpack.c.bf16 %v175_v5, %v174_v4  ;;  %v158_v11 = vld [vmem:[%s3028_s20 + $0x240] sm:$0xff]  ;;  %v176_v14 = vld [vmem:[%s3028_s20 + $0x2d0] sm:$0xff] }
  0x29   :  { %1784 = vmatpush3.bf16.msra.mxu0 %v1783_v34  ;;  %v159_v12 = vld [vmem:[%s3028_s20 + $0x248] sm:$0xff]  ;;  %v82_v13 = vld [vmem:[%s3029_s2 + $0xa0] sm:$0xff]  ;;  %v177_v15 = vld [vmem:[%s3028_s20 + $0x2d8] sm:$0xff] }
  0x2a   :  { %1816 = vmatpush3.bf16.msra.mxu1 %v1815_v35  ;;  %1818 = vmatprep.subr.bf16.mxu0 %v1817_v36  ;;  %v67_v16 = vld [vmem:[%s3029_s2 + $0x28] sm:$0xff]  ;;  %v1835_v17 = vpack.c.bf16 %v159_v12, %v158_v11  ;;  %v1837_v18 = vpack.c.bf16 %v177_v15, %v176_v14  ;;  %v160_v19 = vld [vmem:[%s3028_s20 + $0x250] sm:$0xff]  ;;  %v161_v20 = vld [vmem:[%s3028_s20 + $0x258] sm:$0xff] }
  0x2b   :  { %1849 = vmatprep.subr.bf16.mxu1 %v2044_v50  ;;  %v178_v21 = vld [vmem:[%s3028_s20 + $0x2e0] sm:$0xff]  ;;  %v179_v22 = vld [vmem:[%s3028_s20 + $0x2e8] sm:$0xff]  ;;  %v1839_v24 = vpack.c.bf16 %v161_v20, %v160_v19  ;;  %v180_v28 = vld [vmem:[%s3028_s20 + $0x2f0] sm:$0xff] }
  0x2c   :  { %247 = vmatmul.mubr.f32.vlgmr.msra.gmra.mrb[0].mxu0 %v62_v41  ;;  %v1841_v25 = vpack.c.bf16 %v179_v22, %v178_v21  ;;  %v162_v26 = vld [vmem:[%s3028_s20 + $0x260] sm:$0xff]  ;;  %v163_v27 = vld [vmem:[%s3028_s20 + $0x268] sm:$0xff]  ;;  %v181_v29 = vld [vmem:[%s3028_s20 + $0x2f8] sm:$0xff] }
  0x2d   :  { %332 = vmatmul.mubr.f32.vlgmr.msra.gmra.mrb[0].mxu1 %v64_v43  ;;  %1820 = vmatpush3.bf16.msra.mxu0 %v1819_v42  ;;  %v1843_v30 = vpack.c.bf16 %v163_v27, %v162_v26  ;;  %v1845_v31 = vpack.c.bf16 %v181_v29, %v180_v28  ;;  %v164_v32 = vld [vmem:[%s3028_s20 + $0x270] sm:$0xff]  ;;  %v165_v33 = vld [vmem:[%s3028_s20 + $0x278] sm:$0xff]  ;;  %v543_v35 = vld [vmem:[%s3030_s29] sm:$0xff] }
  0x2e   :  { %1822 = vmatprep.subr.bf16.mxu0 %v1821_v44  ;;  %251 = vmatprep.mubr.f32.mxu0 %v69_v49  ;;  %v1847_v34 = vpack.c.bf16 %v165_v33, %v164_v32  ;;  %v544_v36 = vld [vmem:[%s3030_s29 + $0x8] sm:$0xff]  ;;  %v66_v37 = vld [vmem:[%s3029_s2 + $0x20] sm:$0xff]  ;;  %v73_v39 = vld [vmem:[%s3029_s2 + $0x58] sm:$0xff] }
  0x2f   :  { %336 = vmatprep.mubr.f32.mxu1 %v71_v51  ;;  %v1874_v38 = vpack.c.bf16 %v544_v36, %v543_v35  ;;  %v545_v40 = vld [vmem:[%s3030_s29 + $0x10] sm:$0xff]  ;;  %v546_v41 = vld [vmem:[%s3030_s29 + $0x18] sm:$0xff]  ;;  %v79_v44 = vld [vmem:[%s3029_s2 + $0x88] sm:$0xff] }
  0x30   :  { %252 = vmatmul.mubr.f32.gmra.mrb[2].mxu0 %v68_v53  ;;  %v72_v42 = vld [vmem:[%s3029_s2 + $0x50] sm:$0xff]  ;;  %v1877_v43 = vpack.c.bf16 %v546_v41, %v545_v40  ;;  %v547_v45 = vld [vmem:[%s3030_s29 + $0x20] sm:$0xff]  ;;  %v548_v46 = vld [vmem:[%s3030_s29 + $0x28] sm:$0xff] }
  0x31   :  { %1824 = vmatpush3.bf16.msra.mxu0 %v1823_v52  ;;  %337 = vmatmul.mubr.f32.gmra.mrb[2].mxu1 %v70_v57  ;;  %v78_v47 = vld [vmem:[%s3029_s2 + $0x80] sm:$0xff]  ;;  %v1880_v48 = vpack.c.bf16 %v548_v46, %v547_v45  ;;  %v85_v49 = vld [vmem:[%s3029_s2 + $0xb8] sm:$0xff]  ;;  %v549_v51 = vld [vmem:[%s3030_s29 + $0x30] sm:$0xff] }
  0x32   :  { %1826 = vmatprep.subr.bf16.mxu0 %v1825_v54  ;;  %256 = vmatprep.mubr.f32.mxu0 %v75_v60  ;;  %v550_v52 = vld [vmem:[%s3030_s29 + $0x38] sm:$0xff]  ;;  %v84_v53 = vld [vmem:[%s3029_s2 + $0xb0] sm:$0xff]  ;;  %v551_v55 = vld [vmem:[%s3030_s29 + $0x40] sm:$0xff]  ;;  %s3031_s2 = sld [smem:[#allocation5_spill]] }
  0x33   :  { %341 = vmatprep.mubr.f32.mxu1 %v77_v61  ;;  %v1883_v54 = vpack.c.bf16 %v550_v52, %v549_v51  ;;  %v552_v56 = vld [vmem:[%s3030_s29 + $0x48] sm:$0xff]  ;;  %v553_v58 = vld [vmem:[%s3030_s29 + $0x50] sm:$0xff]  ;;  %v554_v59 = vld [vmem:[%s3030_s29 + $0x58] sm:$0xff] }
  0x34   :  { %257 = vmatmul.mubr.f32.gmra.mrb[4].mxu0 %v74_v63  ;;  %v1886_v57 = vpack.c.bf16 %v552_v56, %v551_v55  ;;  %v1889_v60 = vpack.c.bf16 %v554_v59, %v553_v58  ;;  %v555_v61 = vld [vmem:[%s3030_s29 + $0x60] sm:$0xff]  ;;  %v558_v1 = vld [vmem:[%s3030_s29 + $0x78] sm:$0xff]  ;;  %v450_v5 = vld [vmem:[%s3005_s4 + $0x8] sm:$0xff] }
  0x35   :  { %1828 = vmatpush3.bf16.msra.mxu0 %v1827_v62  ;;  %342 = vmatmul.mubr.f32.gmra.mrb[4].mxu1 %v76_v3  ;;  %v556_v62 = vld [vmem:[%s3030_s29 + $0x68] sm:$0xff]  ;;  %v449_v4 = vld [vmem:[%s3005_s4] sm:$0xff]  ;;  %v456_v14 = vld [vmem:[%s3005_s4 + $0x38] sm:$0xff] }
  0x36   :  { %1830 = vmatprep.subr.bf16.mxu0 %v1829_v0  ;;  %261 = vmatprep.mubr.f32.mxu0 %v81_v6  ;;  %v1892_v63 = vpack.c.bf16 %v556_v62, %v555_v61  ;;  %v557_v0 = vld [vmem:[%s3030_s29 + $0x70] sm:$0xff]  ;;  %v1850_v6 = vpack.c.bf16 %v450_v5, %v449_v4  ;;  %v454_v11 = vld [vmem:[%s3005_s4 + $0x28] sm:$0xff]  ;;  %v460_v20 = vld [vmem:[%s3005_s4 + $0x58] sm:$0xff] }
  0x37   :  { %346 = vmatprep.mubr.f32.mxu1 %v83_v7  ;;  %v1895_v2 = vpack.c.bf16 %v558_v1, %v557_v0  ;;  %v451_v7 = vld [vmem:[%s3005_s4 + $0x10] sm:$0xff]  ;;  %v461_v22 = vld [vmem:[%s3005_s4 + $0x60] sm:$0xff]  ;;  %v464_v27 = vld [vmem:[%s3005_s4 + $0x78] sm:$0xff] }
  0x38   :  { %262 = vmatmul.mubr.f32.gmra.mrb[6].mxu0 %v80_v9  ;;  %v542_v3 = vld [vmem:[%s3031_s2] sm:$0xff]  ;;  %1851 = vmatpush3.bf16.msra.mxu1 %v1850_v6  ;;  %v459_v19 = vld [vmem:[%s3005_s4 + $0x50] sm:$0xff] }
  0x39   :  { %1832 = vmatpush3.bf16.msra.mxu0 %v1831_v8  ;;  %347 = vmatmul.mubr.f32.gmra.mrb[6].mxu1 %v82_v13  ;;  %v452_v8 = vld [vmem:[%s3005_s4 + $0x18] sm:$0xff]  ;;  %v455_v13 = vld [vmem:[%s3005_s4 + $0x30] sm:$0xff]  ;;  %v1865_v21 = vpack.c.bf16 %v460_v20, %v459_v19 }
  0x3a   :  { %1834 = vmatprep.subr.bf16.mxu0 %v1833_v10  ;;  %416 = vmatprep.mubr.f32.mxu0 %v67_v16  ;;  %v1853_v9 = vpack.c.bf16 %v452_v8, %v451_v7  ;;  %v453_v10 = vld [vmem:[%s3005_s4 + $0x20] sm:$0xff]  ;;  %v1859_v15 = vpack.c.bf16 %v456_v14, %v455_v13  ;;  %v463_v26 = vld [vmem:[%s3005_s4 + $0x70] sm:$0xff]  ;;  %v640_v20 = vld [vmem:[%s3007_s8 + $0x18] sm:$0xff] }
  0x3b   :  { %1505 = vmatprep.mubr.msk.f32.mxu1 %vm2045_vm0, %v2046_v23  ;;  %1852 = vmatprep.subr.bf16.mxu1 %v2044_v50  ;;  %v1856_v12 = vpack.c.bf16 %v454_v11, %v453_v10  ;;  %v457_v16 = vld [vmem:[%s3005_s4 + $0x40] sm:$0xff]  ;;  %v1871_v28 = vpack.c.bf16 %v464_v27, %v463_v26  ;;  %v639_v19 = vld [vmem:[%s3007_s8 + $0x10] sm:$0xff]  ;;  %v644_v27 = vld [vmem:[%s3007_s8 + $0x38] sm:$0xff] }
  0x3c   :  { %1854 = vmatpush3.bf16.msra.mxu1 %v1853_v9  ;;  %v637_v14 = vld [vmem:[%s3007_s8] sm:$0xff]  ;;  %v643_v26 = vld [vmem:[%s3007_s8 + $0x30] sm:$0xff] }
  0x3d   :  { %1836 = vmatpush3.bf16.msra.mxu0 %v1835_v17  ;;  %1855 = vmatprep.subr.bf16.mxu1 %v2044_v50  ;;  %v458_v17 = vld [vmem:[%s3005_s4 + $0x48] sm:$0xff] }
  0x3e   :  { %1838 = vmatprep.subr.bf16.mxu0 %v1837_v18  ;;  %v1862_v18 = vpack.c.bf16 %v458_v17, %v457_v16 }
  0x40   :  { %1857 = vmatpush3.bf16.msra.mxu1 %v1856_v12  ;;  %v1197_v12 = vld [vmem:[%s3006_s3] ss:$0 sm:$0xff] }
  0x41   :  { %1840 = vmatpush3.bf16.msra.mxu0 %v1839_v24  ;;  %1858 = vmatprep.subr.bf16.mxu1 %v2044_v50  ;;  %v462_v24 = vld [vmem:[%s3005_s4 + $0x68] sm:$0xff] }
  0x42   :  { %1842 = vmatprep.subr.bf16.mxu0 %v1841_v25  ;;  %v1868_v25 = vpack.c.bf16 %v462_v24, %v461_v22  ;;  %v641_v22 = vld [vmem:[%s3007_s8 + $0x20] sm:$0xff]  ;;  %v642_v24 = vld [vmem:[%s3007_s8 + $0x28] sm:$0xff] }
  0x44   :  { %1860 = vmatpush3.bf16.msra.mxu1 %v1859_v15  ;;  %v638_v15 = vld [vmem:[%s3007_s8 + $0x8] sm:$0xff] }
  0x45   :  { %1844 = vmatpush3.bf16.msra.mxu0 %v1843_v30  ;;  %1861 = vmatprep.subr.bf16.mxu1 %v2044_v50  ;;  %v1898_v17 = vpack.c.bf16 %v638_v15, %v637_v14  ;;  %v845_v14 = vld [vmem:[%s3010_s13 + $0x28] sm:$0xff] }
  0x46   :  { %1846 = vmatprep.subr.bf16.mxu0 %v1845_v31 }
  0x48   :  { %1863 = vmatpush3.bf16.msra.mxu1 %v1862_v18 }
  0x49   :  { %1848 = vmatpush3.bf16.msra.mxu0 %v1847_v34  ;;  %1864 = vmatprep.subr.bf16.mxu1 %v2044_v50 }
  0x4a   :  { %1873 = vmatprep.subr.bf16.mxu0 %v2044_v50 }
  0x4c   :  { %417 = vmatmul.mubr.f32.vlgmr.msra.gmra.mrb[8].mxu0 %v66_v37  ;;  %1866 = vmatpush3.bf16.msra.mxu1 %v1865_v21  ;;  %v1901_v21 = vpack.c.bf16 %v640_v20, %v639_v19  ;;  %v848_v19 = vld [vmem:[%s3010_s13 + $0x40] sm:$0xff]  ;;  %v849_v20 = vld [vmem:[%s3010_s13 + $0x48] sm:$0xff] }
  0x4d   :  { %421 = vmatprep.mubr.f32.mxu0 %v73_v39  ;;  %1875 = vmatpush3.bf16.msra.mxu0 %v1874_v38 }
  0x4e   :  { %1876 = vmatprep.subr.bf16.mxu0 %v2044_v50  ;;  %1867 = vmatprep.subr.bf16.mxu1 %v2044_v50 }
  0x50   :  { %422 = vmatmul.mubr.f32.gmra.mrb[10].mxu0 %v72_v42  ;;  %1869 = vmatpush3.bf16.msra.mxu1 %v1868_v25  ;;  %v1904_v25 = vpack.c.bf16 %v642_v24, %v641_v22  ;;  %v850_v22 = vld [vmem:[%s3010_s13 + $0x50] sm:$0xff]  ;;  %v851_v24 = vld [vmem:[%s3010_s13 + $0x58] sm:$0xff] }
  0x51   :  { %426 = vmatprep.mubr.f32.mxu0 %v79_v44  ;;  %1878 = vmatpush3.bf16.msra.mxu0 %v1877_v43 }
  0x52   :  { %1879 = vmatprep.subr.bf16.mxu0 %v2044_v50  ;;  %1870 = vmatprep.subr.bf16.mxu1 %v2044_v50 }
  0x54   :  { %427 = vmatmul.mubr.f32.gmra.mrb[12].mxu0 %v78_v47  ;;  %1872 = vmatpush3.bf16.msra.mxu1 %v1871_v28 }
  0x55   :  { %431 = vmatprep.mubr.f32.mxu0 %v85_v49  ;;  %1881 = vmatpush3.bf16.msra.mxu0 %v1880_v48 }
  0x56   :  { %1882 = vmatprep.subr.bf16.mxu0 %v2044_v50  ;;  %1897 = vmatprep.subr.bf16.mxu1 %v2044_v50 }
  0x58   :  { %432 = vmatmul.mubr.f32.gmra.mrb[14].mxu0 %v84_v53 }
  0x59   :  { %1884 = vmatpush3.bf16.msra.mxu0 %v1883_v54  ;;  %1540 = vmatprep.mubr.msk.f32.mxu0 %vm2045_vm0, %v2046_v23 }
  0x5a   :  { %1885 = vmatprep.subr.bf16.mxu0 %v2044_v50 }
  0x5d   :  { %1887 = vmatpush3.bf16.msra.mxu0 %v1886_v57 }
  0x5e   :  { %1888 = vmatprep.subr.bf16.mxu0 %v2044_v50 }
  0x61   :  { %1890 = vmatpush3.bf16.msra.mxu0 %v1889_v60 }
  0x62   :  { %1891 = vmatprep.subr.bf16.mxu0 %v2044_v50 }
  0x65   :  { %1893 = vmatpush3.bf16.msra.mxu0 %v1892_v63 }
  0x66   :  { %1894 = vmatprep.subr.bf16.mxu0 %v2044_v50 }
  0x69   :  { %1896 = vmatpush3.bf16.msra.mxu0 %v1895_v2 }
  0x6a   :  { %1921 = vmatprep.subr.bf16.mxu0 %v2044_v50 }
  0x6c   :  { %1541 = vmatmul.mubr.f32.vlgmr.msra.gmra.mrb[16].mxu0 %v542_v3 }
  0x6d   :  { %1610 = vmatprep.mubr.msk.f32.mxu0 %vm2045_vm0, %v2046_v23 }
  0xff   :  { %v1237_v29 = vpop.f32.mrb[0].mxu0 }
 0x100   :  { %v1281_v30 = vpop.f32.mrb[0].mxu1  ;;  %v1238_v31 = vpop.f32.mrb[1].mxu0 }
 0x101   :  { %v1239_v32 = vadd.f32 %v1238_v31, %v1237_v29  ;;  %v1282_v33 = vpop.f32.mrb[1].mxu1  ;;  %v645_v31 = vld [vmem:[%s3007_s8 + $0x40] sm:$0xff] }
 0x102   :  { %v1283_v34 = vadd.f32 %v1282_v33, %v1281_v30  ;;  %v1907_v30 = vpack.c.bf16 %v644_v27, %v643_v26  ;;  %v852_v26 = vld [vmem:[%s3010_s13 + $0x60] sm:$0xff]  ;;  %v853_v27 = vld [vmem:[%s3010_s13 + $0x68] sm:$0xff] }
 0x103   :  { %v1240_v35 = vpop.f32.mrb[2].mxu0 }
 0x104   :  { %v334_v36 = vadd.f32 %v1283_v34, %v1239_v32  ;;  %v1284_v37 = vpop.f32.mrb[2].mxu1  ;;  %v1241_v38 = vpop.f32.mrb[3].mxu0  ;;  %v646_v32 = vld [vmem:[%s3007_s8 + $0x48] sm:$0xff]  ;;  %v647_v34 = vld [vmem:[%s3007_s8 + $0x50] sm:$0xff] }
 0x105   :  { %v1242_v39 = vadd.f32 %v1241_v38, %v1240_v35  ;;  %v1285_v40 = vpop.f32.mrb[3].mxu1  ;;  %v1910_v33 = vpack.c.bf16 %v646_v32, %v645_v31  ;;  %v648_v35 = vld [vmem:[%s3007_s8 + $0x58] sm:$0xff]  ;;  %v650_v38 = vld [vmem:[%s3007_s8 + $0x68] sm:$0xff]  ;;  %v1200_v31 = vld [vmem:[%s3011_s9] ss:$0 sm:$0xff] }
 0x106   :  { %v1286_v41 = vadd.f32 %v1285_v40, %v1284_v37  ;;  %v649_v37 = vld [vmem:[%s3007_s8 + $0x60] sm:$0xff] }
 0x107   :  { %v1243_v42 = vpop.f32.mrb[4].mxu0  ;;  %v1199_v40 = vld [vmem:[%s3008_s7] ss:$0 sm:$0xff] }
 0x108   :  { %v339_v43 = vadd.f32 %v1286_v41, %v1242_v39  ;;  %v1287_v44 = vpop.f32.mrb[4].mxu1  ;;  %v1244_v45 = vpop.f32.mrb[5].mxu0  ;;  %v1916_v39 = vpack.c.bf16 %v650_v38, %v649_v37  ;;  %v651_v41 = vld [vmem:[%s3007_s8 + $0x70] sm:$0xff]  ;;  %v824_v32 = vld [vmem:[%s3012_s12] sm:$0xff] }
 0x109   :  { %v1245_v46 = vadd.f32 %v1244_v45, %v1243_v42  ;;  %v1288_v47 = vpop.f32.mrb[5].mxu1  ;;  %v652_v42 = vld [vmem:[%s3007_s8 + $0x78] sm:$0xff] }
 0x10a   :  { %v1289_v48 = vadd.f32 %v1288_v47, %v1287_v44  ;;  %v1919_v44 = vpack.c.bf16 %v652_v42, %v651_v41  ;;  %v732_v47 = vld [vmem:[%s3009_s10 + $0x8] sm:$0xff]  ;;  %v828_v42 = vld [vmem:[%s3012_s12 + $0x20] sm:$0xff] }
 0x10b   :  { %v1246_v49 = vpop.f32.mrb[6].mxu0 }
 0x10c   :  { %v344_v51 = vadd.f32 %v1289_v48, %v1245_v46  ;;  %v1290_v52 = vpop.f32.mrb[6].mxu1  ;;  %v1247_v53 = vpop.f32.mrb[7].mxu0  ;;  %v731_v46 = vld [vmem:[%s3009_s10] sm:$0xff]  ;;  %v733_v48 = vld [vmem:[%s3009_s10 + $0x10] sm:$0xff] }
 0x10d   :  { %v1248_v54 = vadd.f32 %v1247_v53, %v1246_v49  ;;  %v1291_v55 = vpop.f32.mrb[7].mxu1  ;;  %v1922_v49 = vpack.c.bf16 %v732_v47, %v731_v46  ;;  %v735_v53 = vld [vmem:[%s3009_s10 + $0x20] sm:$0xff]  ;;  %v831_v46 = vld [vmem:[%s3012_s12 + $0x38] sm:$0xff] }
 0x10e   :  { %v1292_v56 = vadd.f32 %v1291_v55, %v1290_v52 }
 0x10f   :  { %1923 = vmatpush3.bf16.msra.mxu0 %v1922_v49  ;;  %v833_v49 = vld [vmem:[%s3012_s12 + $0x48] sm:$0xff] }
 0x110   :  { %v349_v57 = vadd.f32 %v1292_v56, %v1248_v54  ;;  %1924 = vmatprep.subr.bf16.mxu0 %v2044_v50  ;;  %v736_v54 = vld [vmem:[%s3009_s10 + $0x28] sm:$0xff]  ;;  %v737_v56 = vld [vmem:[%s3009_s10 + $0x30] sm:$0xff] }
 0x111   :  { %v1928_v55 = vpack.c.bf16 %v736_v54, %v735_v53  ;;  %v835_v53 = vld [vmem:[%s3012_s12 + $0x58] sm:$0xff] }
 0x11f   :  { %v1325_v58 = vpop.f32.mrb[8].mxu0 }
 0x120   :  { %v1326_v59 = vpop.f32.mrb[9].mxu0 }
 0x121   :  { %v1327_v60 = vadd.f32 %v1326_v59, %v1325_v58  ;;  %v739_v59 = vld [vmem:[%s3009_s10 + $0x40] sm:$0xff] }
 0x123   :  { %v419_v61 = vadd.f32 %v1327_v60, %v334_v36  ;;  %v1328_v62 = vpop.f32.mrb[10].mxu0  ;;  %v1913_v36 = vpack.c.bf16 %v648_v35, %v647_v34  ;;  %v740_v60 = vld [vmem:[%s3009_s10 + $0x48] sm:$0xff] }
 0x124   :  { %v1329_v63 = vpop.f32.mrb[11].mxu0 }
 0x125   :  { %v1330_v0 = vadd.f32 %v1329_v63, %v1328_v62  ;;  %v741_v62 = vld [vmem:[%s3009_s10 + $0x50] sm:$0xff]  ;;  %v742_v63 = vld [vmem:[%s3009_s10 + $0x58] sm:$0xff] }
 0x127   :  { %v424_v1 = vadd.f32 %v1330_v0, %v339_v43  ;;  %v1331_v2 = vpop.f32.mrb[12].mxu0  ;;  %v1937_v0 = vpack.c.bf16 %v742_v63, %v741_v62  ;;  %v854_v63 = vld [vmem:[%s3010_s13 + $0x70] sm:$0xff] }
 0x128   :  { %v1332_v3 = vpop.f32.mrb[13].mxu0 }
 0x129   :  { %v437_v4 = vmax.f32 %v419_v61, %v424_v1  ;;  %v1333_v5 = vadd.f32 %v1332_v3, %v1331_v2  ;;  %v1934_v61 = vpack.c.bf16 %v740_v60, %v739_v59  ;;  %v743_v1 = vld [vmem:[%s3009_s10 + $0x60] sm:$0xff]  ;;  %v744_v2 = vld [vmem:[%s3009_s10 + $0x68] sm:$0xff]  ;;  %v839_v59 = vld [vmem:[%s3012_s12 + $0x78] sm:$0xff] }
 0x12a   :  { %v1940_v3 = vpack.c.bf16 %v744_v2, %v743_v1  ;;  %v1005_v2 = vld [vmem:[%s3014_s15] sm:$0xff] }
 0x12b   :  { %v429_v6 = vadd.f32 %v1333_v5, %v344_v51  ;;  %v1334_v7 = vpop.f32.mrb[14].mxu0  ;;  %v734_v51 = vld [vmem:[%s3009_s10 + $0x18] sm:$0xff] }
 0x12c   :  { %v1335_v8 = vpop.f32.mrb[15].mxu0  ;;  %v1925_v52 = vpack.c.bf16 %v734_v51, %v733_v48  ;;  %v746_v5 = vld [vmem:[%s3009_s10 + $0x78] sm:$0xff]  ;;  %v832_v48 = vld [vmem:[%s3012_s12 + $0x40] sm:$0xff] }
 0x12d   :  { %v1336_v9 = vadd.f32 %v1335_v8, %v1334_v7  ;;  %v840_v7 = vld [vmem:[%s3010_s13] sm:$0xff]  ;;  %v841_v8 = vld [vmem:[%s3010_s13 + $0x8] sm:$0xff]  ;;  %v1982_v51 = vpack.c.bf16 %v833_v49, %v832_v48  ;;  %v1110_v48 = vld [vmem:[%s3016_s17 + $0x58] sm:$0xff] }
 0x12e   :  { %1926 = vmatpush3.bf16.msra.mxu0 %v1925_v52  ;;  %v834_v52 = vld [vmem:[%s3012_s12 + $0x50] sm:$0xff] }
 0x12f   :  { %v434_v10 = vadd.f32 %v1336_v9, %v349_v57  ;;  %1927 = vmatprep.subr.bf16.mxu0 %v2044_v50  ;;  %v738_v57 = vld [vmem:[%s3009_s10 + $0x38] sm:$0xff]  ;;  %v842_v9 = vld [vmem:[%s3010_s13 + $0x10] sm:$0xff]  ;;  %v1985_v54 = vpack.c.bf16 %v835_v53, %v834_v52  ;;  %v1112_v52 = vld [vmem:[%s3016_s17 + $0x68] sm:$0xff] }
 0x130   :  { %v1931_v58 = vpack.c.bf16 %v738_v57, %v737_v56  ;;  %v837_v56 = vld [vmem:[%s3012_s12 + $0x68] sm:$0xff] }
 0x131   :  { %v438_v11 = vmax.f32 %v429_v6, %v434_v10  ;;  %v1946_v10 = vpack.c.bf16 %v841_v8, %v840_v7 }
 0x132   :  { %1929 = vmatpush3.bf16.msra.mxu0 %v1928_v55  ;;  %v836_v55 = vld [vmem:[%s3012_s12 + $0x60] sm:$0xff] }
 0x133   :  { %v439_v13 = vmax.f32 %v437_v4, %v438_v11  ;;  %1930 = vmatprep.subr.bf16.mxu0 %v2044_v50  ;;  %v745_v4 = vld [vmem:[%s3009_s10 + $0x70] sm:$0xff]  ;;  %v843_v11 = vld [vmem:[%s3010_s13 + $0x18] sm:$0xff]  ;;  %v1988_v57 = vpack.c.bf16 %v837_v56, %v836_v55  ;;  %v1202_v55 = vld [vmem:[%s3017_s14] ss:$0 sm:$0xff] }
 0x134   :  { %v1943_v6 = vpack.c.bf16 %v746_v5, %v745_v4  ;;  %v1201_v4 = vld [vmem:[%s3015_s11] ss:$0 sm:$0xff] }
 0x135   :  { %v447_v16 = vadd.f32 %v1197_v12, %v439_v13  ;;  %v1949_v12 = vpack.c.bf16 %v843_v11, %v842_v9  ;;  %v844_v13 = vld [vmem:[%s3010_s13 + $0x20] sm:$0xff]  ;;  %v1007_v9 = vld [vmem:[%s3014_s15 + $0x10] sm:$0xff] }
 0x136   :  { %1932 = vmatpush3.bf16.msra.mxu0 %v1931_v58  ;;  %v1952_v15 = vpack.c.bf16 %v845_v14, %v844_v13  ;;  %v838_v58 = vld [vmem:[%s3012_s12 + $0x70] sm:$0xff]  ;;  %v1010_v13 = vld [vmem:[%s3014_s15 + $0x28] sm:$0xff] }
 0x137   :  { %v448_v18 = vmax.f32 %v447_v16, 0.0  ;;  %1933 = vmatprep.subr.bf16.mxu0 %v2044_v50  ;;  %v846_v16 = vld [vmem:[%s3010_s13 + $0x30] sm:$0xff]  ;;  %v1991_v60 = vpack.c.bf16 %v839_v59, %v838_v58 }
 0x139   :  { %1506 = vmatmul.mubr.f32.vlgmr.msra.gmra.mrb[8].mxu1 %v448_v18 }
 0x13a   :  { %1899 = vmatpush3.bf16.msra.mxu1 %v1898_v17  ;;  %1575 = vmatprep.mubr.msk.f32.mxu1 %vm2045_vm0, %v2046_v23  ;;  %v847_v17 = vld [vmem:[%s3010_s13 + $0x38] sm:$0xff] }
 0x13b   :  { %1900 = vmatprep.subr.bf16.mxu1 %v2044_v50  ;;  %1935 = vmatpush3.bf16.msra.mxu0 %v1934_v61  ;;  %v1955_v18 = vpack.c.bf16 %v847_v17, %v846_v16  ;;  %v1198_v61 = vld [vmem:[%s3013_s5] ss:$0 sm:$0xff] }
 0x13c   :  { %1936 = vmatprep.subr.bf16.mxu0 %v2044_v50  ;;  %v1013_v17 = vld [vmem:[%s3014_s15 + $0x40] sm:$0xff] }
 0x13e   :  { %1902 = vmatpush3.bf16.msra.mxu1 %v1901_v21  ;;  %v1958_v21 = vpack.c.bf16 %v849_v20, %v848_v19  ;;  %v1015_v20 = vld [vmem:[%s3014_s15 + $0x50] sm:$0xff] }
 0x13f   :  { %1903 = vmatprep.subr.bf16.mxu1 %v2044_v50  ;;  %v632_v28 = vpop.f32.mrb[16].mxu0  ;;  %1938 = vmatpush3.bf16.msra.mxu0 %v1937_v0  ;;  %v855_v0 = vld [vmem:[%s3010_s13 + $0x78] sm:$0xff] }
 0x140   :  { %v1542_v29 = vpop.f32.mrb[17].mxu0  ;;  %v633_v43 = vadd.f32 %v1199_v40, %v632_v28  ;;  %1939 = vmatprep.subr.bf16.mxu0 %v2044_v50  ;;  %v1964_v28 = vpack.c.bf16 %v853_v27, %v852_v26  ;;  %v827_v40 = vld [vmem:[%s3012_s12 + $0x18] sm:$0xff]  ;;  %v1967_v1 = vpack.c.bf16 %v855_v0, %v854_v63  ;;  %v1017_v26 = vld [vmem:[%s3014_s15 + $0x60] sm:$0xff]  ;;  %v1018_v27 = vld [vmem:[%s3014_s15 + $0x68] sm:$0xff] }
 0x142   :  { %1905 = vmatpush3.bf16.msra.mxu1 %v1904_v25  ;;  %v636_v45 = vmax.f32 %v633_v43, 0.0  ;;  %v1961_v25 = vpack.c.bf16 %v851_v24, %v850_v22  ;;  %v829_v43 = vld [vmem:[%s3012_s12 + $0x28] sm:$0xff] }
 0x143   :  { %1906 = vmatprep.subr.bf16.mxu1 %v2044_v50  ;;  %1941 = vmatpush3.bf16.msra.mxu0 %v1940_v3  ;;  %v1006_v3 = vld [vmem:[%s3014_s15 + $0x8] sm:$0xff] }
 0x144   :  { %1942 = vmatprep.subr.bf16.mxu0 %v2044_v50 }
 0x146   :  { %1908 = vmatpush3.bf16.msra.mxu1 %v1907_v30 }
 0x147   :  { %1909 = vmatprep.subr.bf16.mxu1 %v2044_v50  ;;  %1944 = vmatpush3.bf16.msra.mxu0 %v1943_v6  ;;  %v1994_v6 = vpack.c.bf16 %v1006_v3, %v1005_v2  ;;  %v1204_v3 = vld [vmem:[%s3019_s18] ss:$0 sm:$0xff] }
 0x148   :  { %1969 = vmatprep.subr.bf16.mxu0 %v2044_v50 }
 0x14a   :  { %1911 = vmatpush3.bf16.msra.mxu1 %v1910_v33  ;;  %v825_v33 = vld [vmem:[%s3012_s12 + $0x8] sm:$0xff] }
 0x14b   :  { %1912 = vmatprep.subr.bf16.mxu1 %v2044_v50  ;;  %v1970_v37 = vpack.c.bf16 %v825_v33, %v824_v32  ;;  %v1099_v32 = vld [vmem:[%s3016_s17] sm:$0xff]  ;;  %v1100_v33 = vld [vmem:[%s3016_s17 + $0x8] sm:$0xff] }
 0x14e   :  { %1914 = vmatpush3.bf16.msra.mxu1 %v1913_v36 }
 0x14f   :  { %1915 = vmatprep.subr.bf16.mxu1 %v2044_v50 }
 0x152   :  { %1917 = vmatpush3.bf16.msra.mxu1 %v1916_v39  ;;  %v826_v39 = vld [vmem:[%s3012_s12 + $0x10] sm:$0xff] }
 0x153   :  { %1918 = vmatprep.subr.bf16.mxu1 %v2044_v50  ;;  %v1973_v41 = vpack.c.bf16 %v827_v40, %v826_v39  ;;  %v1104_v39 = vld [vmem:[%s3016_s17 + $0x28] sm:$0xff] }
 0x156   :  { %1920 = vmatpush3.bf16.msra.mxu1 %v1919_v44  ;;  %v1976_v44 = vpack.c.bf16 %v829_v43, %v828_v42  ;;  %v1106_v42 = vld [vmem:[%s3016_s17 + $0x38] sm:$0xff] }
 0x157   :  { %1945 = vmatprep.subr.bf16.mxu1 %v2044_v50 }
 0x159   :  { %1576 = vmatmul.mubr.f32.vlgmr.msra.gmra.mrb[10].mxu1 %v636_v45  ;;  %v830_v45 = vld [vmem:[%s3012_s12 + $0x30] sm:$0xff] }
 0x15a   :  { %1645 = vmatprep.mubr.msk.f32.mxu1 %vm2045_vm0, %v2046_v23  ;;  %1947 = vmatpush3.bf16.msra.mxu1 %v1946_v10  ;;  %v1979_v47 = vpack.c.bf16 %v831_v46, %v830_v45  ;;  %v1008_v10 = vld [vmem:[%s3014_s15 + $0x18] sm:$0xff]  ;;  %v1108_v45 = vld [vmem:[%s3016_s17 + $0x48] sm:$0xff] }
 0x15b   :  { %1948 = vmatprep.subr.bf16.mxu1 %v2044_v50  ;;  %v1997_v11 = vpack.c.bf16 %v1008_v10, %v1007_v9 }
 0x15e   :  { %1950 = vmatpush3.bf16.msra.mxu1 %v1949_v12  ;;  %v1009_v12 = vld [vmem:[%s3014_s15 + $0x20] sm:$0xff] }
 0x15f   :  { %1951 = vmatprep.subr.bf16.mxu1 %v2044_v50  ;;  %v2000_v14 = vpack.c.bf16 %v1010_v13, %v1009_v12 }
 0x162   :  { %1953 = vmatpush3.bf16.msra.mxu1 %v1952_v15  ;;  %v1011_v15 = vld [vmem:[%s3014_s15 + $0x30] sm:$0xff] }
 0x163   :  { %1954 = vmatprep.subr.bf16.mxu1 %v2044_v50 }
 0x166   :  { %1956 = vmatpush3.bf16.msra.mxu1 %v1955_v18  ;;  %v1014_v18 = vld [vmem:[%s3014_s15 + $0x48] sm:$0xff] }
 0x167   :  { %1957 = vmatprep.subr.bf16.mxu1 %v2044_v50  ;;  %v2006_v19 = vpack.c.bf16 %v1014_v18, %v1013_v17 }
 0x16a   :  { %1959 = vmatpush3.bf16.msra.mxu1 %v1958_v21  ;;  %v1016_v21 = vld [vmem:[%s3014_s15 + $0x58] sm:$0xff] }
 0x16b   :  { %1960 = vmatprep.subr.bf16.mxu1 %v2044_v50  ;;  %v2009_v22 = vpack.c.bf16 %v1016_v21, %v1015_v20 }
 0x16e   :  { %1962 = vmatpush3.bf16.msra.mxu1 %v1961_v25 }
 0x16f   :  { %1963 = vmatprep.subr.bf16.mxu1 %v2044_v50 }
 0x172   :  { %1965 = vmatpush3.bf16.msra.mxu1 %v1964_v28  ;;  %v2012_v28 = vpack.c.bf16 %v1018_v27, %v1017_v26 }
 0x173   :  { %1966 = vmatprep.subr.bf16.mxu1 %v2044_v50 }
 0x176   :  { %1968 = vmatpush3.bf16.msra.mxu1 %v1967_v1 }
 0x177   :  { %1993 = vmatprep.subr.bf16.mxu1 %v2044_v50 }
 0x20c   :  { %v538_v29 = vpop.f32.mrb[8].mxu1 }
 0x20d   :  { %v1507_v30 = vpop.f32.mrb[9].mxu1  ;;  %v539_v62 = vadd.f32 %v1198_v61, %v538_v29  ;;  %v1019_v29 = vld [vmem:[%s3014_s15 + $0x70] sm:$0xff]  ;;  %v1114_v61 = vld [vmem:[%s3016_s17 + $0x78] sm:$0xff] }
 0x20e   :  { %v1020_v30 = vld [vmem:[%s3014_s15 + $0x78] sm:$0xff] }
 0x22c   :  { %v726_v34 = vpop.f32.mrb[10].mxu1 }
 0x22d   :  { %v727_v35 = vadd.f32 %v1200_v31, %v726_v34  ;;  %v1577_v36 = vpop.f32.mrb[11].mxu1  ;;  %v2015_v31 = vpack.c.bf16 %v1020_v30, %v1019_v29  ;;  %v1101_v34 = vld [vmem:[%s3016_s17 + $0x10] sm:$0xff] }
 0x22e   :  { %v1102_v36 = vld [vmem:[%s3016_s17 + $0x18] sm:$0xff] }
 0x22f   :  { %v730_v38 = vmax.f32 %v727_v35, 0.0  ;;  %v2018_v35 = vpack.c.bf16 %v1100_v33, %v1099_v32 }
 0x231   :  { %1611 = vmatmul.mubr.f32.vlgmr.msra.gmra.mrb[18].mxu0 %v730_v38  ;;  %v1103_v38 = vld [vmem:[%s3016_s17 + $0x20] sm:$0xff] }
 0x232   :  { %1971 = vmatpush3.bf16.msra.mxu0 %v1970_v37  ;;  %1680 = vmatprep.mubr.msk.f32.mxu0 %vm2045_vm0, %v2046_v23  ;;  %v2021_v37 = vpack.c.bf16 %v1102_v36, %v1101_v34  ;;  %v2024_v40 = vpack.c.bf16 %v1104_v39, %v1103_v38 }
 0x233   :  { %1972 = vmatprep.subr.bf16.mxu0 %v2044_v50 }
 0x236   :  { %1974 = vmatpush3.bf16.msra.mxu0 %v1973_v41  ;;  %v1105_v41 = vld [vmem:[%s3016_s17 + $0x30] sm:$0xff] }
 0x237   :  { %1975 = vmatprep.subr.bf16.mxu0 %v2044_v50  ;;  %v2027_v43 = vpack.c.bf16 %v1106_v42, %v1105_v41 }
 0x23a   :  { %1977 = vmatpush3.bf16.msra.mxu0 %v1976_v44  ;;  %v1107_v44 = vld [vmem:[%s3016_s17 + $0x40] sm:$0xff] }
 0x23b   :  { %1978 = vmatprep.subr.bf16.mxu0 %v2044_v50  ;;  %v2030_v46 = vpack.c.bf16 %v1108_v45, %v1107_v44 }
 0x23e   :  { %1980 = vmatpush3.bf16.msra.mxu0 %v1979_v47  ;;  %v1109_v47 = vld [vmem:[%s3016_s17 + $0x50] sm:$0xff] }
 0x23f   :  { %1981 = vmatprep.subr.bf16.mxu0 %v2044_v50  ;;  %v2033_v49 = vpack.c.bf16 %v1110_v48, %v1109_v47 }
 0x242   :  { %1983 = vmatpush3.bf16.msra.mxu0 %v1982_v51  ;;  %v1111_v51 = vld [vmem:[%s3016_s17 + $0x60] sm:$0xff] }
 0x243   :  { %1984 = vmatprep.subr.bf16.mxu0 %v2044_v50  ;;  %v2036_v53 = vpack.c.bf16 %v1112_v52, %v1111_v51 }
 0x246   :  { %1986 = vmatpush3.bf16.msra.mxu0 %v1985_v54 }
 0x247   :  { %1987 = vmatprep.subr.bf16.mxu0 %v2044_v50 }
 0x24a   :  { %1989 = vmatpush3.bf16.msra.mxu0 %v1988_v57 }
 0x24b   :  { %1990 = vmatprep.subr.bf16.mxu0 %v2044_v50 }
 0x24e   :  { %1992 = vmatpush3.bf16.msra.mxu0 %v1991_v60  ;;  %v1113_v60 = vld [vmem:[%s3016_s17 + $0x70] sm:$0xff] }
 0x24f   :  { %2017 = vmatprep.subr.bf16.mxu0 %v2044_v50 }
 0x251   :  { %1681 = vmatmul.mubr.f32.vlgmr.msra.gmra.mrb[20].mxu0 %v539_v62  ;;  %v2039_v62 = vpack.c.bf16 %v1114_v61, %v1113_v60 }
 0x252   :  { %1750 = vmatprep.mubr.msk.f32.mxu0 %vm2045_vm0, %v2046_v23  ;;  %2019 = vmatpush3.bf16.msra.mxu0 %v2018_v35 }
 0x253   :  { %2020 = vmatprep.subr.bf16.mxu0 %v2044_v50 }
 0x256   :  { %2022 = vmatpush3.bf16.msra.mxu0 %v2021_v37 }
 0x257   :  { %2023 = vmatprep.subr.bf16.mxu0 %v2044_v50 }
 0x25a   :  { %2025 = vmatpush3.bf16.msra.mxu0 %v2024_v40 }
 0x25b   :  { %2026 = vmatprep.subr.bf16.mxu0 %v2044_v50 }
 0x25e   :  { %2028 = vmatpush3.bf16.msra.mxu0 %v2027_v43 }
 0x25f   :  { %2029 = vmatprep.subr.bf16.mxu0 %v2044_v50 }
 0x262   :  { %2031 = vmatpush3.bf16.msra.mxu0 %v2030_v46 }
 0x263   :  { %2032 = vmatprep.subr.bf16.mxu0 %v2044_v50 }
 0x266   :  { %2034 = vmatpush3.bf16.msra.mxu0 %v2033_v49 }
 0x267   :  { %2035 = vmatprep.subr.bf16.mxu0 %v2044_v50 }
 0x26a   :  { %2037 = vmatpush3.bf16.msra.mxu0 %v2036_v53 }
 0x26b   :  { %2038 = vmatprep.subr.bf16.mxu0 %v2044_v50 }
 0x26e   :  { %2040 = vmatpush3.bf16.msra.mxu0 %v2039_v62 }
 0x304   :  { %v820_v5 = vpop.f32.mrb[18].mxu0 }
 0x305   :  { %v821_v7 = vadd.f32 %v1201_v4, %v820_v5  ;;  %v1612_v8 = vpop.f32.mrb[19].mxu0 }
 0x307   :  { %1646 = vmatmul.mubr.f32.vlgmr.msra.gmra.mrb[12].mxu1 %v821_v7 }
 0x308   :  { %1995 = vmatpush3.bf16.msra.mxu1 %v1994_v6  ;;  %1715 = vmatprep.mubr.msk.f32.mxu1 %vm2045_vm0, %v2046_v23  ;;  %v1012_v23 = vld [vmem:[%s3014_s15 + $0x38] sm:$0xff] }
 0x309   :  { %1996 = vmatprep.subr.bf16.mxu1 %v2044_v50  ;;  %v2003_v16 = vpack.c.bf16 %v1012_v23, %v1011_v15 }
 0x30c   :  { %1998 = vmatpush3.bf16.msra.mxu1 %v1997_v11 }
 0x30d   :  { %1999 = vmatprep.subr.bf16.mxu1 %v2044_v50 }
 0x310   :  { %2001 = vmatpush3.bf16.msra.mxu1 %v2000_v14 }
 0x311   :  { %2002 = vmatprep.subr.bf16.mxu1 %v2044_v50 }
 0x314   :  { %2004 = vmatpush3.bf16.msra.mxu1 %v2003_v16 }
 0x315   :  { %2005 = vmatprep.subr.bf16.mxu1 %v2044_v50 }
 0x318   :  { %2007 = vmatpush3.bf16.msra.mxu1 %v2006_v19 }
 0x319   :  { %2008 = vmatprep.subr.bf16.mxu1 %v2044_v50 }
 0x31c   :  { %2010 = vmatpush3.bf16.msra.mxu1 %v2009_v22 }
 0x31d   :  { %2011 = vmatprep.subr.bf16.mxu1 %v2044_v50 }
 0x320   :  { %2013 = vmatpush3.bf16.msra.mxu1 %v2012_v28 }
 0x321   :  { %2014 = vmatprep.subr.bf16.mxu1 %v2044_v50  ;;  %v1203_v50 = vld [vmem:[%s3018_s16] ss:$0 sm:$0xff] }
 0x324   :  { %v992_v24 = vpop.f32.mrb[20].mxu0  ;;  %2016 = vmatpush3.bf16.msra.mxu1 %v2015_v31 }
 0x325   :  { %v1682_v25 = vpop.f32.mrb[21].mxu0 }
 0x3da   :  { %v922_v54 = vpop.f32.mrb[12].mxu1 }
 0x3db   :  { %v993_v56 = vadd.f32 %v992_v24, %v922_v54  ;;  %v1647_v57 = vpop.f32.mrb[13].mxu1 }
 0x3dd   :  { %v1003_v58 = vadd.f32 %v1202_v55, %v993_v56 }
 0x3df   :  { %v1004_v59 = vmax.f32 %v1003_v58, 0.0 }
 0x3e1   :  { %1716 = vmatmul.mubr.f32.vlgmr.msra.gmra.mrb[14].mxu1 %v1004_v59 }
 0x4b4   :  { %v1094_v63 = vpop.f32.mrb[14].mxu1 }
 0x4b5   :  { %v1095_v0 = vadd.f32 %v1203_v50, %v1094_v63  ;;  %v1717_v1 = vpop.f32.mrb[15].mxu1 }
 0x4b7   :  { %v1098_v2 = vmax.f32 %v1095_v0, 0.0 }
 0x4b9   :  { %1751 = vmatmul.mubr.f32.vlgmr.msra.gmra.mrb[22].mxu0 %v1098_v2 }
 0x58c   :  { %v1188_v4 = vpop.f32.mrb[22].mxu0 }
 0x58d   :  { %v1189_v5 = vadd.f32 %v1204_v3, %v1188_v4  ;;  %v1752_v6 = vpop.f32.mrb[23].mxu0 }
 0x58f   :  { %1192 = vst [vmem:[%s3020_s19] sm:$0xff] %v1189_v5 }

</bundles_post_ra>
